<compile_context>
chip_gen: v7x
topology: tpu7x:2x2x1
jax: 0.10.0
libtpu: 0.0.40
codegen_flags: <defaults>
</compile_context>

<pallas_src>
import functools

import jax
import jax.numpy as jnp
from jax import lax
from jax.experimental import pallas as pl
from jax.experimental.pallas import tpu as pltpu


def _round_up(v, m):
    return ((v + m - 1) // m) * m


def _ls_ce_kernel(x_ref, tgt_ref, out_ref, *, smoothing, confidence,
                  n_classes, n_rows, tile_n):
    # x tile: (tile_n, c_pad); math in f32 (v5e has no bf16 VPU/EUP).
    x = x_ref[...].astype(jnp.float32)
    tn, cp = x.shape

    col = lax.broadcasted_iota(jnp.int32, (tn, cp), 1)
    valid_c = col < n_classes                       # mask padded classes
    neg = jnp.float32(-1e30)

    # Row-wise stabilized logsumexp without materializing logprobs.
    m = jnp.max(jnp.where(valid_c, x, neg), axis=-1, keepdims=True)      # (tn,1)
    e = jnp.exp(jnp.where(valid_c, x - m, neg))                          # pad -> 0
    lse = m + jnp.log(jnp.sum(e, axis=-1, keepdims=True))                # (tn,1)

    # sum over true classes (for the smoothing term).
    sum_x = jnp.sum(jnp.where(valid_c, x, 0.0), axis=-1, keepdims=True)  # (tn,1)

    # Gather x[tgt] via one-hot masked reduce (no dynamic gather on TPU).
    tgt = tgt_ref[...]                                                   # (tn,1) i32
    onehot = jnp.logical_and(col == tgt, valid_c)
    x_tgt = jnp.sum(jnp.where(onehot, x, 0.0), axis=-1, keepdims=True)   # (tn,1)

    nll = lse - x_tgt                                                    # (tn,1)
    smooth = lse - sum_x * jnp.float32(1.0 / n_classes)                  # (tn,1)
    loss = jnp.float32(confidence) * nll + jnp.float32(smoothing) * smooth

    # Mask rows beyond the true batch (last tile padding).
    row = pl.program_id(0) * tile_n + lax.broadcasted_iota(jnp.int32, (tn, 1), 0)
    out_ref[...] = jnp.where(row < n_rows, loss, 0.0)


def label_smoothing_cross_entropy(x, target, smoothing=0.1):
    """x: (N, C) float logits; target: (N,) int class ids. Returns scalar f32."""
    assert smoothing < 1.0
    n, c = x.shape
    confidence = 1.0 - smoothing

    # Lane-dense class axis.
    c_pad = max(128, _round_up(c, 128))

    # Tile over N: target ~4 MiB per input buffer (double-buffered => ~8 MiB,
    # plus f32 temps, comfortably inside v7x's 32 MiB scoped VMEM), rows a
    # multiple of 8 (sublanes), capped at 1024.
    bytes_per_row = c_pad * jnp.dtype(x.dtype).itemsize
    tile_n = (4 * 2**20) // max(1, bytes_per_row)
    tile_n = int(max(8, min(1024, (tile_n // 8) * 8)))
    tile_n = min(tile_n, _round_up(n, 8))
    n_pad = _round_up(n, tile_n)
    num_tiles = n_pad // tile_n

    x_p = jnp.pad(x, ((0, n_pad - n), (0, c_pad - c)))
    tgt_p = jnp.pad(target.astype(jnp.int32).reshape(n, 1), ((0, n_pad - n), (0, 0)))

    in_tile_bytes = tile_n * c_pad * jnp.dtype(x.dtype).itemsize
    f32_tile_bytes = tile_n * c_pad * 4
    vmem_limit = int(min(96 * 2**20,
                         max(32 * 2**20, 2 * in_tile_bytes + 4 * f32_tile_bytes)))

    kernel = functools.partial(
        _ls_ce_kernel,
        smoothing=float(smoothing),
        confidence=float(confidence),
        n_classes=c,
        n_rows=n,
        tile_n=tile_n,
    )

    per_row = pl.pallas_call(
        kernel,
        out_shape=jax.ShapeDtypeStruct((n_pad, 1), jnp.float32),
        grid_spec=pltpu.PrefetchScalarGridSpec(
            num_scalar_prefetch=0,
            grid=(num_tiles,),
            in_specs=[
                pl.BlockSpec((tile_n, c_pad), lambda i: (i, 0)),   # x tile
                pl.BlockSpec((tile_n, 1), lambda i: (i, 0)),       # target tile
            ],
            out_specs=pl.BlockSpec((tile_n, 1), lambda i: (i, 0)),  # per-row loss
        ),
        compiler_params=pltpu.CompilerParams(
            dimension_semantics=("parallel",),
            vmem_limit_bytes=vmem_limit,
        ),
    )(x_p, tgt_p)

    # Padded rows were masked to 0 in-kernel; divide by the true batch size.
    return jnp.sum(per_row) / jnp.float32(n)


def _reference(x, target, smoothing=0.1):
    confidence = 1.0 - smoothing
    logprobs = jax.nn.log_softmax(x.astype(jnp.float32), axis=-1)
    nll = -jnp.take_along_axis(logprobs, target[:, None], axis=-1)[:, 0]
    smooth = -jnp.mean(logprobs, axis=-1)
    return jnp.mean(confidence * nll + smoothing * smooth)


if __name__ == "__main__":
    key = jax.random.PRNGKey(0)
    kx, kt = jax.random.split(key)

    # Small shapes consistent with the module: batch=8, num_classes=32.
    N, C = 8, 32
    x = jax.random.normal(kx, (N, C), dtype=jnp.float32)
    target = jax.random.randint(kt, (N,), 0, C, dtype=jnp.int32)

    loss = jax.block_until_ready(label_smoothing_cross_entropy(x, target, smoothing=0.1))
    ref = _reference(x, target, smoothing=0.1)
    assert jnp.allclose(loss, ref, atol=1e-5, rtol=1e-5), (loss, ref)

    # Exercise the padding/masking paths (N not multiple of 8, C not multiple of 128).
    N2, C2 = 10, 50
    x2 = jax.random.normal(kx, (N2, C2), dtype=jnp.float32)
    t2 = jax.random.randint(kt, (N2,), 0, C2, dtype=jnp.int32)
    loss2 = jax.block_until_ready(label_smoothing_cross_entropy(x2, t2, smoothing=0.1))
    ref2 = _reference(x2, t2, smoothing=0.1)
    assert jnp.allclose(loss2, ref2, atol=1e-5, rtol=1e-5), (loss2, ref2)

    print("KERNEL_OK")
</pallas_src>

<mosaic_0001>
module attributes {stable_mosaic.version = 11 : i64} {
  func.func @_ls_ce_kernel(%arg0: i32, %arg1: memref<8x128xf32, #tpu.memory_space<vmem>>, %arg2: memref<8x1xi32, #tpu.memory_space<vmem>>, %arg3: memref<8x1xf32, #tpu.memory_space<vmem>>) attributes {dimension_semantics = [#tpu.dimension_semantics<parallel>], iteration_bounds = array<i64: 1>, scalar_prefetch = 0 : i64, scratch_operands = 0 : i64, tpu.core_type = #tpu.core_type<tc>, window_params = [{transform_indices = @transform_0, window_bounds = array<i64: 8, 128>}, {transform_indices = @transform_1, window_bounds = array<i64: 8, 1>}, {transform_indices = @transform_2, window_bounds = array<i64: 8, 1>}]} {
    %c0 = arith.constant 0 : index
    %c0_0 = arith.constant 0 : index
    %0 = vector.load %arg1[%c0, %c0_0] : memref<8x128xf32, #tpu.memory_space<vmem>>, vector<8x128xf32>
    %1 = tpu.iota {dimensions = array<i32: 1>} : vector<8x128xi32>
    %c32_i32 = arith.constant 32 : i32
    %2 = vector.broadcast %c32_i32 : i32 to vector<8x128xi32>
    %3 = arith.cmpi slt, %1, %2 : vector<8x128xi32>
    %cst = arith.constant -1.000000e+30 : f32
    %4 = vector.broadcast %cst : f32 to vector<8x128xf32>
    %5 = arith.select %3, %0, %4 : vector<8x128xi1>, vector<8x128xf32>
    %cst_1 = arith.constant dense<0xFF800000> : vector<8xf32>
    %6 = vector.multi_reduction <maximumf>, %5, %cst_1 [1] : vector<8x128xf32> to vector<8xf32>
    %7 = vector.shape_cast %6 : vector<8xf32> to vector<8x1xf32>
    %8 = vector.broadcast %7 : vector<8x1xf32> to vector<8x128xf32>
    %9 = arith.subf %0, %8 : vector<8x128xf32>
    %cst_2 = arith.constant -1.000000e+30 : f32
    %10 = vector.broadcast %cst_2 : f32 to vector<8x128xf32>
    %11 = arith.select %3, %9, %10 : vector<8x128xi1>, vector<8x128xf32>
    %12 = math.exp %11 : vector<8x128xf32>
    %cst_3 = arith.constant dense<0.000000e+00> : vector<8xf32>
    %13 = vector.multi_reduction <add>, %12, %cst_3 [1] : vector<8x128xf32> to vector<8xf32>
    %14 = vector.shape_cast %13 : vector<8xf32> to vector<8x1xf32>
    %15 = math.log %14 : vector<8x1xf32>
    %16 = arith.addf %7, %15 : vector<8x1xf32>
    %cst_4 = arith.constant 0.000000e+00 : f32
    %17 = vector.broadcast %cst_4 : f32 to vector<8x128xf32>
    %18 = arith.select %3, %0, %17 : vector<8x128xi1>, vector<8x128xf32>
    %cst_5 = arith.constant dense<0.000000e+00> : vector<8xf32>
    %19 = vector.multi_reduction <add>, %18, %cst_5 [1] : vector<8x128xf32> to vector<8xf32>
    %20 = vector.shape_cast %19 : vector<8xf32> to vector<8x1xf32>
    %c0_6 = arith.constant 0 : index
    %c0_7 = arith.constant 0 : index
    %21 = vector.load %arg2[%c0_6, %c0_7] : memref<8x1xi32, #tpu.memory_space<vmem>>, vector<8x1xi32>
    %22 = vector.broadcast %21 : vector<8x1xi32> to vector<8x128xi32>
    %23 = arith.cmpi eq, %1, %22 : vector<8x128xi32>
    %24 = arith.andi %23, %3 : vector<8x128xi1>
    %cst_8 = arith.constant 0.000000e+00 : f32
    %25 = vector.broadcast %cst_8 : f32 to vector<8x128xf32>
    %26 = arith.select %24, %0, %25 : vector<8x128xi1>, vector<8x128xf32>
    %cst_9 = arith.constant dense<0.000000e+00> : vector<8xf32>
    %27 = vector.multi_reduction <add>, %26, %cst_9 [1] : vector<8x128xf32> to vector<8xf32>
    %28 = vector.shape_cast %27 : vector<8xf32> to vector<8x1xf32>
    %29 = arith.subf %16, %28 : vector<8x1xf32>
    %cst_10 = arith.constant 3.125000e-02 : f32
    %30 = vector.broadcast %cst_10 : f32 to vector<8x1xf32>
    %31 = arith.mulf %20, %30 : vector<8x1xf32>
    %32 = arith.subf %16, %31 : vector<8x1xf32>
    %cst_11 = arith.constant 0.899999976 : f32
    %33 = vector.broadcast %cst_11 : f32 to vector<8x1xf32>
    %34 = arith.mulf %33, %29 : vector<8x1xf32>
    %cst_12 = arith.constant 1.000000e-01 : f32
    %35 = vector.broadcast %cst_12 : f32 to vector<8x1xf32>
    %36 = arith.mulf %35, %32 : vector<8x1xf32>
    %37 = arith.addf %34, %36 : vector<8x1xf32>
    %c8_i32 = arith.constant 8 : i32
    %38 = arith.muli %arg0, %c8_i32 : i32
    %39 = tpu.iota {dimensions = array<i32: 0>} : vector<8x1xi32>
    %40 = vector.broadcast %38 : i32 to vector<8x1xi32>
    %41 = arith.addi %40, %39 : vector<8x1xi32>
    %c8_i32_13 = arith.constant 8 : i32
    %42 = vector.broadcast %c8_i32_13 : i32 to vector<8x1xi32>
    %43 = arith.cmpi slt, %41, %42 : vector<8x1xi32>
    %cst_14 = arith.constant 0.000000e+00 : f32
    %44 = vector.broadcast %cst_14 : f32 to vector<8x1xf32>
    %45 = arith.select %43, %37, %44 : vector<8x1xi1>, vector<8x1xf32>
    %c0_15 = arith.constant 0 : index
    %c0_16 = arith.constant 0 : index
    %46 = vector.load %arg3[%c0_15, %c0_16] : memref<8x1xf32, #tpu.memory_space<vmem>>, vector<8x1xf32>
    tpu.vector_store %arg3[%c0_15, %c0_16], %45 {strides = array<i32>} : memref<8x1xf32, #tpu.memory_space<vmem>>, vector<8x1xf32>,
    return
  }
  func.func @transform_0(%arg0: i32) -> (i32, i32) {
    %c0_i32 = arith.constant 0 : i32
    %c0_i32_0 = arith.constant 0 : i32
    return %arg0, %c0_i32 : i32, i32
  }
  func.func @transform_1(%arg0: i32) -> (i32, i32) {
    %c0_i32 = arith.constant 0 : i32
    %c0_i32_0 = arith.constant 0 : i32
    return %arg0, %c0_i32 : i32, i32
  }
  func.func @transform_2(%arg0: i32) -> (i32, i32) {
    %c0_i32 = arith.constant 0 : i32
    %c0_i32_0 = arith.constant 0 : i32
    return %arg0, %c0_i32 : i32, i32
  }
}

</mosaic_0001>

<bundles_post_ra>
// kernel: tpu_custom_call.1
= control target key start
LH: loop header
LB: loop body
LE: loop exit
PB: predicated region body
PF: predicated region fallthrough
CT: control target
= control target key end

     0   :  { %v12_v0 = vlaneseq  ;;  %v64_v1 = vmov 0   ;;  %vm52_vm3 = vcmask 7168   ;;  %s93_s0 = inlined_call_operand.vmem [shape: f32[8,128], index: 0, kind: input, shape index: {}]   ;;  %s94_s1 = inlined_call_operand.vmem [shape: s32[8,1], index: 1, kind: input, shape index: {}]   ;;  %s95_s2 = inlined_call_operand.vmem [shape: f32[8,1], index: 2, kind: output, shape index: {}]  }
   0x1   :  { %59 = vset.pattern.permute.xlu0 %v64_v1  ;;  %v11_v2 = vld [vmem:[%s93_s0] sm:$0xff] }
   0x2   :  { %v13_v3 = vand.u32 127, %v12_v0  ;;  %v30_v5 = vld [vmem:[%s94_s1] sm:$0xff] }
   0x4   :  { %vm14_vm0 = vcmp.lt.s32.totalorder %v13_v3, 32 }
   0x5   :  { %v15_v4 = vsel %vm14_vm0, %v11_v2, -1e+30  ;;  %v27_v12 = vsel %vm14_vm0, %v11_v2, 0.0 }
   0x6   :  { %16 = vmax.xlane.f32.xlu0 %v15_v4 }
  0x1c   :  { %32 = vperm.xlu0 %59, %v30_v5  }
  0x93   :  { %v17_v6 = vpop.xlane.xlu0 %16 }
  0x94   :  { %v18_v7 = vsub.f32 %v11_v2, %v17_v6 }
  0x96   :  { %v19_v8 = vsel %vm14_vm0, %v18_v7, -1e+30 }
  0x97   :  { %v20_v9 = vmul.f32 1.442695, %v19_v8 }
  0x99   :  { %60 = vpow2.f32 %v20_v9 }
  0x9b   :  { %v33_v10 = vpop.permute.xlu0 %32 }
  0x9c   :  { %vm34_vm1 = vcmp.eq.s32.totalorder %v13_v3, %v33_v10 }
  0x9d   :  { %vm35_vm2 = vmand %vm34_vm1, %vm14_vm0 }
  0x9e   :  { %v36_v13 = vsel %vm35_vm2, %v11_v2, 0.0 }
  0xa3   :  { %v61_v11 = vpop.eup %60 }
  0xa4   :  { %22 = vadd.xlane.f32.xlu1 %v61_v11 }
  0xa8   :  { %28 = vadd.xlane.f32.xlu1 %v27_v12 }
  0xac   :  { %37 = vadd.xlane.f32.xlu1 %v36_v13 }
 0x131   :  { %v23_v14 = vpop.xlane.xlu1 %22 }
 0x132   :  { %62 = vlog2.f32 %v23_v14 }
 0x135   :  { %v29_v15 = vpop.xlane.xlu1 %28 }
 0x136   :  { %v40_v20 = vmul.f32 0.03125, %v29_v15 }
 0x139   :  { %v38_v18 = vpop.xlane.xlu1 %37 }
 0x13c   :  { %v63_v16 = vpop.eup %62 }
 0x13d   :  { %v25_v17 = vmul.f32 0.6931472, %v63_v16 }
 0x13f   :  { %v26_v19 = vadd.f32 %v25_v17, %v17_v6 }
 0x141   :  { %v41_v21 = vsub.f32 %v26_v19, %v40_v20  ;;  %v39_v22 = vsub.f32 %v26_v19, %v38_v18 }
 0x143   :  { %v43_v23 = vmul.f32 0.1, %v41_v21  ;;  %v42_v24 = vmul.f32 0.9, %v39_v22 }
 0x145   :  { %v44_v25 = vadd.f32 %v43_v23, %v42_v24 }
 0x147   :  { %53 = vst.msk [vmem:[%s95_s2] sm:$0xff] %vm52_vm3, %v44_v25 }

</bundles_post_ra>
